<compile_context>
chip_gen: v6e
topology: v6e:2x2x1
jax: 0.10.0
libtpu: 0.0.40
codegen_flags: <defaults>
</compile_context>

<pallas_src>
import jax
import jax.numpy as jnp
from jax.experimental import pallas as pl
from jax.experimental.pallas import tpu as pltpu

HIDDEN_DIM = 32   # stands in for constant.hidden_dim
TOPIC_NUM = 20
BATCH = 8         # small example batch

_NEG_BIG = -1e30  # padded-logit bias (kept in f32): exp(_NEG_BIG - m) underflows to exactly 0
_LANES = 128
_SUBLANES = 16    # bf16 rows pack two per sublane -> keep batch tiles multiples of 16


def discriminator_kernel(x_ref, w_ref, b_ref, o_ref):
    """Fused: gradient-reverse (identity fwd) -> linear -> (eval) dropout -> softmax(dim=1)."""
    # fc1: X @ W^T + b.  X/W are bf16 (native MXU rate); accumulation, bias add and softmax are f32.
    logits = jnp.dot(x_ref[...], w_ref[...],
                     preferred_element_type=jnp.float32) + b_ref[...]   # (tb, T_pad) f32

    # TODO(synk): nn.Dropout is stochastic in train mode; treated as identity (eval mode) here.
    # TODO(synk): ReverseLayerF only alters the backward pass (forward is identity); training-time
    #             gradient reversal would need a custom_vjp wrapped around this call.

    # softmax over dim=1 (topic axis == lane axis). Padded lanes carry -1e30 bias -> prob exactly 0.
    m = jnp.max(logits, axis=1, keepdims=True)
    e = jnp.exp(logits - m)
    denom = jnp.sum(e, axis=1, keepdims=True)
    o_ref[...] = (e / denom).astype(o_ref.dtype)   # exact normalization: rows sum to 1


def prepare_discriminator_params(w, b):
    """One-time layout plumbing, hoisted out of the per-call path.

    w: (T, H) PyTorch nn.Linear weight; b: (T,).
    Returns:
      w_t   : (H, T_pad) bf16, W^T zero-padded along the lane (topic) axis to a multiple of 128.
      b_row : (1, T_pad) f32, bias with padded lanes set to -1e30 so they softmax to exactly 0.
    """
    T, H = w.shape
    assert b.shape == (T,)
    T_pad = pl.cdiv(T, _LANES) * _LANES
    w_t = jnp.zeros((H, T_pad), jnp.bfloat16).at[:, :T].set(w.T.astype(jnp.bfloat16))
    b_row = jnp.full((1, T_pad), _NEG_BIG, jnp.float32).at[0, :T].set(b.astype(jnp.float32))
    return w_t, b_row


def discriminator_forward(x, w_t, b_row, topic_num, *, block_b=1024):
    """x: (B, H); w_t/b_row from prepare_discriminator_params.  Returns (B, topic_num) probs."""
    B, H = x.shape
    Hw, T_pad = w_t.shape
    assert Hw == H and b_row.shape == (1, T_pad)

    # Single batch block whenever it fits (problem is launch/per-grid-step overhead bound).
    tb_cap = ((block_b + _SUBLANES - 1) // _SUBLANES) * _SUBLANES
    tb_all = ((B + _SUBLANES - 1) // _SUBLANES) * _SUBLANES
    tb = min(tb_cap, tb_all)
    Bp = pl.cdiv(B, tb) * tb

    x_p = x.astype(jnp.bfloat16)
    if Bp != B:
        x_p = jnp.pad(x_p, ((0, Bp - B), (0, 0)))

    cost = pl.CostEstimate(
        flops=2 * Bp * H * T_pad,
        transcendentals=Bp * T_pad,                               # the exp
        bytes_accessed=2 * (Bp * H + H * T_pad) + 4 * (T_pad + Bp * T_pad),
    )

    out = pl.pallas_call(
        discriminator_kernel,
        out_shape=jax.ShapeDtypeStruct((Bp, T_pad), jnp.float32),
        grid=(Bp // tb,),                                         # (1,) at this size
        in_specs=[
            pl.BlockSpec((tb, H), lambda i: (i, 0)),              # X tile (pipelines only if grid > 1)
            pl.BlockSpec((H, T_pad), lambda i: (0, 0)),           # W^T stays VMEM-resident
            pl.BlockSpec((1, T_pad), lambda i: (0, 0)),           # bias row stays VMEM-resident
        ],
        out_specs=pl.BlockSpec((tb, T_pad), lambda i: (i, 0)),
        compiler_params=pltpu.CompilerParams(
            dimension_semantics=("arbitrary",)),
        cost_estimate=cost,
    )(x_p, w_t, b_row)

    # Strip batch padding and the lane padding of the topic axis.
    # (On v5e a padded-layout-aware consumer can skip this extra copy entirely.)
    return out[:B, :topic_num]


def reference_forward(x, w, b):
    logits = x @ w.T + b
    return jax.nn.softmax(logits, axis=1)


if __name__ == "__main__":
    key = jax.random.PRNGKey(0)
    k_x, k_w, k_b = jax.random.split(key, 3)

    # Deterministic synthetic parameters (shapes per nn.Linear(hidden_dim, topic_num)).
    bound = 1.0 / (HIDDEN_DIM ** 0.5)
    w = jax.random.uniform(k_w, (TOPIC_NUM, HIDDEN_DIM), jnp.float32, -bound, bound)
    b = jax.random.uniform(k_b, (TOPIC_NUM,), jnp.float32, -bound, bound)
    x = jax.random.normal(k_x, (BATCH, HIDDEN_DIM), jnp.float32)

    # One-time parameter layout prep (hoisted out of the hot path).
    w_t, b_row = prepare_discriminator_params(w, b)

    out = discriminator_forward(x, w_t, b_row, TOPIC_NUM)
    out = jax.block_until_ready(out)

    ref = reference_forward(x, w, b)
    assert out.shape == (BATCH, TOPIC_NUM)
    # Tolerance covers bf16 MXU inputs (f32 accumulation keeps the error small with K=32).
    assert jnp.allclose(out, ref, atol=5e-3, rtol=5e-3), float(jnp.max(jnp.abs(out - ref)))
    # Exact normalization: softmax rows sum to 1 (padded lanes contribute exactly 0).
    assert jnp.allclose(jnp.sum(out, axis=1), jnp.ones((BATCH,)), atol=1e-4)

    print("KERNEL_OK")
</pallas_src>

<mosaic_0001>
module attributes {stable_mosaic.version = 11 : i64} {
  func.func @discriminator_kernel(%arg0: i32, %arg1: memref<16x32xbf16, #tpu.memory_space<vmem>>, %arg2: memref<32x128xbf16, #tpu.memory_space<vmem>>, %arg3: memref<1x128xf32, #tpu.memory_space<vmem>>, %arg4: memref<16x128xf32, #tpu.memory_space<vmem>>) attributes {dimension_semantics = [#tpu.dimension_semantics<arbitrary>], iteration_bounds = array<i64: 1>, scalar_prefetch = 0 : i64, scratch_operands = 0 : i64, tpu.core_type = #tpu.core_type<tc>, window_params = [{transform_indices = @transform_0, window_bounds = array<i64: 16, 32>}, {pipeline_mode = #tpu.pipeline_mode<synchronous>, transform_indices = @transform_1, window_bounds = array<i64: 32, 128>}, {pipeline_mode = #tpu.pipeline_mode<synchronous>, transform_indices = @transform_2, window_bounds = array<i64: 1, 128>}, {transform_indices = @transform_3, window_bounds = array<i64: 16, 128>}]} {
    %c0 = arith.constant 0 : index
    %c0_0 = arith.constant 0 : index
    %0 = vector.load %arg1[%c0, %c0_0] : memref<16x32xbf16, #tpu.memory_space<vmem>>, vector<16x32xbf16>
    %c0_1 = arith.constant 0 : index
    %c0_2 = arith.constant 0 : index
    %1 = vector.load %arg2[%c0_1, %c0_2] : memref<32x128xbf16, #tpu.memory_space<vmem>>, vector<32x128xbf16>
    %cst = arith.constant dense<0.000000e+00> : vector<16x128xf32>
    %2 = tpu.matmul %0, %1, %cst {dimension_numbers = #tpu.dot_dimension_numbers<[1], [0], [0], [1], [0, 0, 1, 1], [], []>} : vector<16x32xbf16>, vector<32x128xbf16>, vector<16x128xf32> -> vector<16x128xf32>
    %c0_3 = arith.constant 0 : index
    %c0_4 = arith.constant 0 : index
    %3 = vector.load %arg3[%c0_3, %c0_4] : memref<1x128xf32, #tpu.memory_space<vmem>>, vector<1x128xf32>
    %4 = vector.broadcast %3 : vector<1x128xf32> to vector<16x128xf32>
    %5 = arith.addf %2, %4 : vector<16x128xf32>
    %cst_5 = arith.constant dense<0xFF800000> : vector<16xf32>
    %6 = vector.multi_reduction <maximumf>, %5, %cst_5 [1] : vector<16x128xf32> to vector<16xf32>
    %7 = vector.shape_cast %6 : vector<16xf32> to vector<16x1xf32>
    %8 = vector.broadcast %7 : vector<16x1xf32> to vector<16x128xf32>
    %9 = arith.subf %5, %8 : vector<16x128xf32>
    %10 = math.exp %9 : vector<16x128xf32>
    %cst_6 = arith.constant dense<0.000000e+00> : vector<16xf32>
    %11 = vector.multi_reduction <add>, %10, %cst_6 [1] : vector<16x128xf32> to vector<16xf32>
    %12 = vector.shape_cast %11 : vector<16xf32> to vector<16x1xf32>
    %13 = vector.broadcast %12 : vector<16x1xf32> to vector<16x128xf32>
    %14 = arith.divf %10, %13 : vector<16x128xf32>
    %c0_7 = arith.constant 0 : index
    %c0_8 = arith.constant 0 : index
    %15 = vector.load %arg4[%c0_7, %c0_8] : memref<16x128xf32, #tpu.memory_space<vmem>>, vector<16x128xf32>
    tpu.vector_store %arg4[%c0_7, %c0_8], %14 {strides = array<i32>} : memref<16x128xf32, #tpu.memory_space<vmem>>, vector<16x128xf32>,
    return
  }
  func.func @transform_0(%arg0: i32) -> (i32, i32) {
    %c0_i32 = arith.constant 0 : i32
    %c0_i32_0 = arith.constant 0 : i32
    return %arg0, %c0_i32 : i32, i32
  }
  func.func @transform_1(%arg0: i32) -> (i32, i32) {
    %c0_i32 = arith.constant 0 : i32
    %c0_i32_0 = arith.constant 0 : i32
    %c0_i32_1 = arith.constant 0 : i32
    return %c0_i32, %c0_i32_0 : i32, i32
  }
  func.func @transform_2(%arg0: i32) -> (i32, i32) {
    %c0_i32 = arith.constant 0 : i32
    %c0_i32_0 = arith.constant 0 : i32
    %c0_i32_1 = arith.constant 0 : i32
    return %c0_i32, %c0_i32_0 : i32, i32
  }
  func.func @transform_3(%arg0: i32) -> (i32, i32) {
    %c0_i32 = arith.constant 0 : i32
    %c0_i32_0 = arith.constant 0 : i32
    return %arg0, %c0_i32 : i32, i32
  }
}

</mosaic_0001>

<bundles_post_ra>
// kernel: tpu_custom_call.1
= control target key start
LH: loop header
LB: loop body
LE: loop exit
PB: predicated region body
PF: predicated region fallthrough
CT: control target
= control target key end

     0   :  { %8 = vsyncpa [#allocation3], 0  ;;  %s300_s0 = inlined_call_operand.hbm [shape: bf16[16,32], index: 0, kind: input, shape index: {}]   ;;  %s301_s1 = inlined_call_operand.hbm [shape: bf16[32,128], index: 1, kind: input, shape index: {}]   ;;  %s302_s2 = inlined_call_operand.vmem [shape: f32[1,128], index: 2, kind: input, shape index: {}]   ;;  %s303_s3 = inlined_call_operand.hbm [shape: f32[16,128], index: 3, kind: output, shape index: {}]  }
   0x1   :  { %9 = vsyncpa [#allocation6], 0 }
   0x2   :  { %10 = vsyncpa [#allocation4], 0  ;;  %s259_s12 = smov [#allocation2]  }
   0x3   :  { %s16_s13 = sshll.u32 %s259_s12, 4  ;;  %s17_s13 = int_to_ptr.vmem [resolvable:$true] %s16_s13 }
   0x4   :  { %s201_s14 = scalar_lea.vmem %s17_s13, 128  ;;  %p206_p1 = scmp.lt.s32.totalorder %s17_s13, %s17_s13 }
   0x5   :  { %p202_p0 = scmp.ne.s32.totalorder %s17_s13, %s201_s14  ;;  %p207_p2 = scmp.lt.s32.totalorder %s201_s14, %s201_s14 }
   0x7   :  { %p208_p3 = por %p207_p2, %p206_p1 }
   0x9   :  { %p209_p4 = pnand %p208_p3, %p202_p0 }
   0xb   :  { %212 = shalt.err (!%p209_p4)
}
   0xc   :  { %s260_s15 = smov 64   ;;  %s261_s16 = smov 4  }
   0xd   :  { %22 = dma.hbm_to_vmem [thread:$0]  %s300_s0, 128, %s17_s13, [#allocation3], %s260_s15, %s260_s15, %s261_s16  }
   0xe   :  { %s262_s19 = smov [#allocation5]  }
   0xf   :  { %s28_s20 = sshll.u32 %s262_s19, 4  ;;  %s29_s20 = int_to_ptr.vmem [resolvable:$true] %s28_s20 }
  0x10   :  { %s221_s21 = scalar_lea.vmem %s29_s20, 256  ;;  %p226_p6 = scmp.lt.s32.totalorder %s29_s20, %s29_s20 }
  0x11   :  { %p222_p5 = scmp.ne.s32.totalorder %s29_s20, %s221_s21  ;;  %p227_p7 = scmp.lt.s32.totalorder %s221_s21, %s221_s21 }
  0x13   :  { %p228_p8 = por %p227_p7, %p226_p6 }
  0x15   :  { %p229_p9 = pnand %p228_p8, %p222_p5 }
  0x17   :  { %232 = shalt.err (!%p229_p9)
}
  0x18   :  { %34 = dma.hbm_to_vmem [thread:$0]  %s301_s1, 256, %s29_s20, [#allocation6], %s260_s15, %s260_s15, %s261_s16  }
  0x19   :  { %253 = dma.done.wait [#allocation3], 128  }
  0x1a   :  { %254 = vsyncadd [#allocation3], 4294967168 }
  0x1b   :  { %255 = dma.done.wait [#allocation6], 256  }
  0x1c   :  { %256 = vsyncadd [#allocation6], 4294967040  ;;  %v263_v0 = vmov 0.0   ;;  %vm264_vm0 = vmmov 0   ;;  %v182_v1 = vld [vmem:[#allocation5 + $0x8] sm:$0xff]   ;;  %v183_v2 = vld [vmem:[#allocation5] sm:$0xff]  }
  0x1d   :  { %165 = vmatprep.subr.bf16.mxu0 %v263_v0  ;;  %169 = vmatprep.mubr.msk.bf16.mxu0 %vm264_vm0, %v263_v0  ;;  %v184_v3 = vld [vmem:[#allocation2] sm:$0xff]   ;;  %vm74_vm1 = vcmask 261120   ;;  %s265_s1 = smov [#allocation7]  }
  0x1e   :  { %166 = vmatpush3.bf16.msra.mxu0 %v182_v1  ;;  %v157_v4 = vld [vmem:[%s302_s2] ss:$0 sm:$0xff]  ;;  %s144_s2 = sshll.u32 %s265_s1, 4  ;;  %s145_s2 = int_to_ptr.vmem [resolvable:$true] %s144_s2 }
  0x1f   :  { %167 = vmatprep.subr.bf16.mxu0 %v263_v0  ;;  %s233_s25 = scalar_lea.vmem %s145_s2, 256  ;;  %p238_p11 = scmp.lt.s32.totalorder %s145_s2, %s145_s2 }
  0x20   :  { %p234_p10 = scmp.ne.s32.totalorder %s145_s2, %s233_s25  ;;  %p239_p12 = scmp.lt.s32.totalorder %s233_s25, %s233_s25 }
  0x22   :  { %168 = vmatpush3.bf16.msra.mxu0 %v183_v2  ;;  %p240_p13 = por %p239_p12, %p238_p11 }
  0x24   :  { %p241_p0 = pnand %p240_p13, %p234_p10 }
  0x25   :  { %170 = vmatmul.mubr.msk.bf16.vlgmr.msra.gmra.mxu0 %vm74_vm1, %v184_v3 }
  0xe5   :  { %v112_v5 = vpop.f32.mrf.mxu0 }
  0xe6   :  { %v113_v6 = vadd.f32 %v157_v4, %v112_v5 }
  0xe7   :  { %v171_v7 = vpop.f32.mrf.mxu0 }
  0xe8   :  { %119 = vmax.xlane.f32.xlu0 %v113_v6 }
  0xe9   :  { %v115_v8 = vpop.f32.mrf.mxu0 }
  0xea   :  { %v116_v9 = vadd.f32 %v157_v4, %v115_v8 }
  0xeb   :  { %v172_v10 = vpop.f32.mrf.mxu0 }
  0xec   :  { %121 = vmax.xlane.f32.xlu0 %v116_v9 }
 0x171   :  { %v120_v11 = vpop.xlane.xlu0 %119 }
 0x172   :  { %v123_v12 = vsub.f32 %v113_v6, %v120_v11 }
 0x174   :  { %v125_v13 = vmul.f32 1.442695, %v123_v12 }
 0x175   :  { %v122_v14 = vpop.xlane.xlu0 %121 }
 0x176   :  { %185 = vpow2.f32 %v125_v13  ;;  %v124_v15 = vsub.f32 %v116_v9, %v122_v14 }
 0x178   :  { %v127_v16 = vmul.f32 1.442695, %v124_v15 }
 0x17a   :  { %187 = vpow2.f32 %v127_v16 }
 0x183   :  { %v186_v17 = vpop.eup %185 }
 0x184   :  { %129 = vadd.xlane.f32.xlu1 %v186_v17 }
 0x187   :  { %v188_v18 = vpop.eup %187 }
 0x188   :  { %131 = vadd.xlane.f32.xlu1 %v188_v18 }
 0x20d   :  { %v130_v19 = vpop.xlane.xlu1 %129 }
 0x20e   :  { %189 = vrcp.f32 %v130_v19 }
 0x211   :  { %v132_v20 = vpop.xlane.xlu1 %131 }
 0x212   :  { %191 = vrcp.f32 %v132_v20 }
 0x21b   :  { %v190_v21 = vpop.eup %189 }
 0x21c   :  { %v134_v22 = vmul.f32 %v190_v21, %v186_v17 }
 0x21e   :  { %137 = vst [vmem:[#allocation7] sm:$0xff] %v134_v22 }
 0x21f   :  { %v192_v23 = vpop.eup %191 }
 0x220   :  { %v136_v24 = vmul.f32 %v192_v23, %v188_v18 }
 0x222   :  { %138 = vst [vmem:[#allocation7 + $0x8] sm:$0xff] %v136_v24 }
 0x223   :  { %244 = shalt.err (!%p241_p0)
}
 0x224   :  { %s266_s26 = smov 128   ;;  %s267_s27 = smov 8  }
 0x225   :  { %150 = dma.vmem_to_hbm [thread:$0]  %s145_s2, 256, %s303_s3, [#allocation4], %s266_s26, %s266_s26, %s267_s27  }
 0x226   :  { %257 = dma.done.wait [#allocation4], 256  }
 0x227   :  { %258 = vsyncadd [#allocation4], 4294967040 }
 0x228   :  { %154 = vsyncpa [#allocation3], 1 }
 0x229   :  { %155 = vsyncpa [#allocation6], 1 }
 0x22a   :  { %156 = vsyncpa [#allocation4], 1 }

</bundles_post_ra>
